<compile_context>
chip_gen: v6e
topology: v6e:2x2x1
jax: 0.10.0
libtpu: 0.0.40
codegen_flags: <defaults>
</compile_context>

<pallas_src>
import jax
import jax.numpy as jnp
from jax.experimental import pallas as pl
from jax.experimental.pallas import tpu as pltpu


def _round_up(x, m):
    return (x + m - 1) // m * m


def _block_diag2(w):
    """blkdiag(w, w): (R, C) -> (2R, 2C).  Done once at param-prep time."""
    r, c = w.shape
    z = jnp.zeros((r, c), w.dtype)
    top = jnp.concatenate([w, z], axis=1)
    bot = jnp.concatenate([z, w], axis=1)
    return jnp.concatenate([top, bot], axis=0)


def _rnd_mlp_kernel(s_ref, a_ref, w1s_ref, w1a_ref, b1_ref, w2_ref, b2_ref,
                    o_ref):
    """Fused 2-layer MLP on paired rows (all tiles 128 lanes wide):

        h   = ReLU(s2 @ blkdiag(W1_s) + a2 @ blkdiag(W1_a) + [b1,b1])
        out = ReLU(h  @ blkdiag(W2)   + [b2,b2])

    Matmul inputs bf16, accumulation / bias / ReLU in f32.
    """
    xs = s_ref[...].astype(jnp.bfloat16)
    xa = a_ref[...].astype(jnp.bfloat16)

    h = jnp.dot(xs, w1s_ref[...], preferred_element_type=jnp.float32)
    h = h + jnp.dot(xa, w1a_ref[...], preferred_element_type=jnp.float32)
    h = jnp.maximum(h + b1_ref[...], 0.0)                     # (tb2, 2H) f32

    y = jnp.dot(h.astype(jnp.bfloat16), w2_ref[...],
                preferred_element_type=jnp.float32)
    y = jnp.maximum(y + b2_ref[...], 0.0)

    o_ref[...] = y.astype(o_ref.dtype)


def rnd_forward(state, action, params, *, block_b=4096, out_dtype=jnp.float32):
    """Canonical ModelBaseRND forward: dense(cat([state, action], -1)).

    state:  (B, state_size)  float32 (bf16 also accepted)
    action: (B, action_size) float32 (bf16 also accepted)
    params: pre-paired (block-diagonal) params from init_params()
    returns (B, dense_n)     out_dtype (default float32)
    """
    w1s2, w1a2, b1_2, w2_2, b2_2 = params
    B, S = state.shape
    A = action.shape[1]
    H2 = w2_2.shape[1]            # 2 * dense_n  (lane-dense width, 128)
    H = H2 // 2

    # Pair adjacent batch rows: (B, F) -> (B/2, 2F).  Free (contiguous view)
    # for even B; odd B pads one dead row only.
    if B % 2:
        state = jnp.pad(state, ((0, 1), (0, 0)))
        action = jnp.pad(action, ((0, 1), (0, 0)))
    B2 = (B + 1) // 2
    s2 = state.reshape(B2, 2 * S)
    a2 = action.reshape(B2, 2 * A)

    # Paired-row tile: multiple of 8 sublanes.  Pallas clips the partial last
    # block, so we never pad the batch to a multiple of the tile.
    tb2 = max(8, min(block_b // 2, _round_up(B2, 8)))
    tb2 = _round_up(tb2, 8)
    grid = (pl.cdiv(B2, tb2),)

    cost = pl.CostEstimate(
        flops=2 * B * ((S + A) * H + H * H),
        transcendentals=0,
        bytes_accessed=B * 4 * (S + A + H)
        + 2 * (2 * (S + A) * H2 + H2 * H2) + 2 * 4 * H2,
    )

    out2 = pl.pallas_call(
        _rnd_mlp_kernel,
        out_shape=jax.ShapeDtypeStruct((B2, H2), out_dtype),
        grid=grid,
        in_specs=[
            pl.BlockSpec((tb2, 2 * S), lambda i: (i, 0)),   # paired state tile
            pl.BlockSpec((tb2, 2 * A), lambda i: (i, 0)),   # paired action tile
            pl.BlockSpec((2 * S, H2), lambda i: (0, 0)),    # blkdiag W1_s (resident)
            pl.BlockSpec((2 * A, H2), lambda i: (0, 0)),    # blkdiag W1_a (resident)
            pl.BlockSpec((1, H2), lambda i: (0, 0)),        # [b1, b1]     (resident)
            pl.BlockSpec((H2, H2), lambda i: (0, 0)),       # blkdiag W2   (resident)
            pl.BlockSpec((1, H2), lambda i: (0, 0)),        # [b2, b2]     (resident)
        ],
        out_specs=pl.BlockSpec((tb2, H2), lambda i: (i, 0)),
        compiler_params=pltpu.CompilerParams(
            dimension_semantics=("parallel",),              # megacore on v7x
            vmem_limit_bytes=32 * 1024 * 1024,              # headroom for big tiles
        ),
        cost_estimate=cost,
    )(s2, a2, w1s2, w1a2, b1_2, w2_2, b2_2)

    out = out2.reshape(2 * B2, H)                           # free contiguous view
    return out[:B] if 2 * B2 != B else out


def init_params(state_size, action_size, dense_n=64, key=None):
    """Synthetic parameters matching LinearLayers(state+action, 64, 2),
    pre-packed once into the paired (block-diagonal) layout the kernel uses.
    Weights bf16 (MXU inputs), biases f32.
    """
    if key is None:
        key = jax.random.PRNGKey(0)
    in_dim = state_size + action_size
    k1, k2, k3, k4 = jax.random.split(key, 4)
    w1 = (jax.random.normal(k1, (in_dim, dense_n), jnp.float32)
          / jnp.sqrt(jnp.float32(in_dim)))
    b1 = jax.random.normal(k2, (1, dense_n), jnp.float32) * 0.01
    w2 = (jax.random.normal(k3, (dense_n, dense_n), jnp.float32)
          / jnp.sqrt(jnp.float32(dense_n)))
    b2 = jax.random.normal(k4, (1, dense_n), jnp.float32) * 0.01
    # TODO(synk): bias init differs from PyTorch's default uniform(-1/sqrt(fan));
    #             only relevant for exact parity with nn.Linear.
    w1s2 = _block_diag2(w1[:state_size]).astype(jnp.bfloat16)   # (2S, 2H)
    w1a2 = _block_diag2(w1[state_size:]).astype(jnp.bfloat16)   # (2A, 2H)
    b1_2 = jnp.concatenate([b1, b1], axis=-1)                   # (1, 2H) f32
    w2_2 = _block_diag2(w2).astype(jnp.bfloat16)                # (2H, 2H)
    b2_2 = jnp.concatenate([b2, b2], axis=-1)                   # (1, 2H) f32
    return (w1s2, w1a2, b1_2, w2_2, b2_2)


if __name__ == "__main__":
    # Small shapes consistent with the module (vector state + vector action).
    # batch=50 with block_b=16 exercises multi-step tiling (grid=(4,)) plus the
    # clipped partial last block; the default-block call exerces grid=(1,).
    batch = 50
    state_size = 32
    action_size = 8
    dense_n = 64

    key = jax.random.PRNGKey(0)
    k_state, k_action, k_params = jax.random.split(key, 3)
    state = jax.random.normal(k_state, (batch, state_size), jnp.float32)
    action = jax.random.normal(k_action, (batch, action_size), jnp.float32)

    params = init_params(state_size, action_size, dense_n, key=k_params)

    out_small = jax.block_until_ready(
        rnd_forward(state, action, params, block_b=16))
    out_big = jax.block_until_ready(
        rnd_forward(state, action, params))           # default block_b=4096

    # Pure-JAX reference with identical math (bf16 matmul inputs, f32 accum),
    # built from the plain (un-paired) weight blocks sliced out of the packed
    # params — validates both the MLP math and the pairing layout.
    w1s2, w1a2, b1_2, w2_2, b2_2 = params
    w1s = w1s2[:state_size, :dense_n]
    w1a = w1a2[:action_size, :dense_n]
    b1 = b1_2[:, :dense_n]
    w2 = w2_2[:dense_n, :dense_n]
    b2 = b2_2[:, :dense_n]
    xs = state.astype(jnp.bfloat16)
    xa = action.astype(jnp.bfloat16)
    h = (jnp.dot(xs, w1s, preferred_element_type=jnp.float32)
         + jnp.dot(xa, w1a, preferred_element_type=jnp.float32))
    h = jnp.maximum(h + b1, 0.0)
    y = jnp.dot(h.astype(jnp.bfloat16), w2, preferred_element_type=jnp.float32)
    ref = jnp.maximum(y + b2, 0.0)

    assert out_small.shape == (batch, dense_n)
    assert out_big.shape == (batch, dense_n)
    assert jnp.allclose(out_small, ref, atol=5e-3, rtol=5e-3)
    assert jnp.allclose(out_big, ref, atol=5e-3, rtol=5e-3)

    print("KERNEL_OK")
</pallas_src>

<mosaic_0001>
module attributes {stable_mosaic.version = 11 : i64} {
  func.func @_rnd_mlp_kernel(%arg0: i32, %arg1: memref<8x64xf32, #tpu.memory_space<vmem>>, %arg2: memref<8x16xf32, #tpu.memory_space<vmem>>, %arg3: memref<64x128xbf16, #tpu.memory_space<vmem>>, %arg4: memref<16x128xbf16, #tpu.memory_space<vmem>>, %arg5: memref<1x128xf32, #tpu.memory_space<vmem>>, %arg6: memref<128x128xbf16, #tpu.memory_space<vmem>>, %arg7: memref<1x128xf32, #tpu.memory_space<vmem>>, %arg8: memref<8x128xf32, #tpu.memory_space<vmem>>) attributes {dimension_semantics = [#tpu.dimension_semantics<parallel>], iteration_bounds = array<i64: 4>, scalar_prefetch = 0 : i64, scratch_operands = 0 : i64, tpu.core_type = #tpu.core_type<tc>, window_params = [{transform_indices = @transform_0, window_bounds = array<i64: 8, 64>}, {transform_indices = @transform_1, window_bounds = array<i64: 8, 16>}, {pipeline_mode = #tpu.pipeline_mode<synchronous>, transform_indices = @transform_2, window_bounds = array<i64: 64, 128>}, {pipeline_mode = #tpu.pipeline_mode<synchronous>, transform_indices = @transform_3, window_bounds = array<i64: 16, 128>}, {pipeline_mode = #tpu.pipeline_mode<synchronous>, transform_indices = @transform_4, window_bounds = array<i64: 1, 128>}, {pipeline_mode = #tpu.pipeline_mode<synchronous>, transform_indices = @transform_5, window_bounds = array<i64: 128, 128>}, {pipeline_mode = #tpu.pipeline_mode<synchronous>, transform_indices = @transform_6, window_bounds = array<i64: 1, 128>}, {transform_indices = @transform_7, window_bounds = array<i64: 8, 128>}]} {
    %c0 = arith.constant 0 : index
    %c0_0 = arith.constant 0 : index
    %0 = vector.load %arg1[%c0, %c0_0] : memref<8x64xf32, #tpu.memory_space<vmem>>, vector<8x64xf32>
    %1 = arith.truncf %0 : vector<8x64xf32> to vector<8x64xbf16>
    %c0_1 = arith.constant 0 : index
    %c0_2 = arith.constant 0 : index
    %2 = vector.load %arg2[%c0_1, %c0_2] : memref<8x16xf32, #tpu.memory_space<vmem>>, vector<8x16xf32>
    %3 = arith.truncf %2 : vector<8x16xf32> to vector<8x16xbf16>
    %c0_3 = arith.constant 0 : index
    %c0_4 = arith.constant 0 : index
    %4 = vector.load %arg3[%c0_3, %c0_4] : memref<64x128xbf16, #tpu.memory_space<vmem>>, vector<64x128xbf16>
    %cst = arith.constant dense<0.000000e+00> : vector<8x128xf32>
    %5 = tpu.matmul %1, %4, %cst {dimension_numbers = #tpu.dot_dimension_numbers<[1], [0], [0], [1], [0, 0, 1, 1], [], []>} : vector<8x64xbf16>, vector<64x128xbf16>, vector<8x128xf32> -> vector<8x128xf32>
    %c0_5 = arith.constant 0 : index
    %c0_6 = arith.constant 0 : index
    %6 = vector.load %arg4[%c0_5, %c0_6] : memref<16x128xbf16, #tpu.memory_space<vmem>>, vector<16x128xbf16>
    %cst_7 = arith.constant dense<0.000000e+00> : vector<8x128xf32>
    %7 = tpu.matmul %3, %6, %cst_7 {dimension_numbers = #tpu.dot_dimension_numbers<[1], [0], [0], [1], [0, 0, 1, 1], [], []>} : vector<8x16xbf16>, vector<16x128xbf16>, vector<8x128xf32> -> vector<8x128xf32>
    %8 = arith.addf %5, %7 : vector<8x128xf32>
    %c0_8 = arith.constant 0 : index
    %c0_9 = arith.constant 0 : index
    %9 = vector.load %arg5[%c0_8, %c0_9] : memref<1x128xf32, #tpu.memory_space<vmem>>, vector<1x128xf32>
    %10 = vector.broadcast %9 : vector<1x128xf32> to vector<8x128xf32>
    %11 = arith.addf %8, %10 : vector<8x128xf32>
    %cst_10 = arith.constant 0.000000e+00 : f32
    %12 = vector.broadcast %cst_10 : f32 to vector<8x128xf32>
    %13 = arith.maximumf %11, %12 : vector<8x128xf32>
    %14 = arith.truncf %13 : vector<8x128xf32> to vector<8x128xbf16>
    %c0_11 = arith.constant 0 : index
    %c0_12 = arith.constant 0 : index
    %15 = vector.load %arg6[%c0_11, %c0_12] : memref<128x128xbf16, #tpu.memory_space<vmem>>, vector<128x128xbf16>
    %cst_13 = arith.constant dense<0.000000e+00> : vector<8x128xf32>
    %16 = tpu.matmul %14, %15, %cst_13 {dimension_numbers = #tpu.dot_dimension_numbers<[1], [0], [0], [1], [0, 0, 1, 1], [], []>} : vector<8x128xbf16>, vector<128x128xbf16>, vector<8x128xf32> -> vector<8x128xf32>
    %c0_14 = arith.constant 0 : index
    %c0_15 = arith.constant 0 : index
    %17 = vector.load %arg7[%c0_14, %c0_15] : memref<1x128xf32, #tpu.memory_space<vmem>>, vector<1x128xf32>
    %18 = vector.broadcast %17 : vector<1x128xf32> to vector<8x128xf32>
    %19 = arith.addf %16, %18 : vector<8x128xf32>
    %cst_16 = arith.constant 0.000000e+00 : f32
    %20 = vector.broadcast %cst_16 : f32 to vector<8x128xf32>
    %21 = arith.maximumf %19, %20 : vector<8x128xf32>
    %c0_17 = arith.constant 0 : index
    %c0_18 = arith.constant 0 : index
    %22 = vector.load %arg8[%c0_17, %c0_18] : memref<8x128xf32, #tpu.memory_space<vmem>>, vector<8x128xf32>
    tpu.vector_store %arg8[%c0_17, %c0_18], %21 {strides = array<i32>} : memref<8x128xf32, #tpu.memory_space<vmem>>, vector<8x128xf32>,
    return
  }
  func.func @transform_0(%arg0: i32) -> (i32, i32) {
    %c0_i32 = arith.constant 0 : i32
    %c0_i32_0 = arith.constant 0 : i32
    return %arg0, %c0_i32 : i32, i32
  }
  func.func @transform_1(%arg0: i32) -> (i32, i32) {
    %c0_i32 = arith.constant 0 : i32
    %c0_i32_0 = arith.constant 0 : i32
    return %arg0, %c0_i32 : i32, i32
  }
  func.func @transform_2(%arg0: i32) -> (i32, i32) {
    %c0_i32 = arith.constant 0 : i32
    %c0_i32_0 = arith.constant 0 : i32
    %c0_i32_1 = arith.constant 0 : i32
    return %c0_i32, %c0_i32_0 : i32, i32
  }
  func.func @transform_3(%arg0: i32) -> (i32, i32) {
    %c0_i32 = arith.constant 0 : i32
    %c0_i32_0 = arith.constant 0 : i32
    %c0_i32_1 = arith.constant 0 : i32
    return %c0_i32, %c0_i32_0 : i32, i32
  }
  func.func @transform_4(%arg0: i32) -> (i32, i32) {
    %c0_i32 = arith.constant 0 : i32
    %c0_i32_0 = arith.constant 0 : i32
    %c0_i32_1 = arith.constant 0 : i32
    return %c0_i32, %c0_i32_0 : i32, i32
  }
  func.func @transform_5(%arg0: i32) -> (i32, i32) {
    %c0_i32 = arith.constant 0 : i32
    %c0_i32_0 = arith.constant 0 : i32
    %c0_i32_1 = arith.constant 0 : i32
    return %c0_i32, %c0_i32_0 : i32, i32
  }
  func.func @transform_6(%arg0: i32) -> (i32, i32) {
    %c0_i32 = arith.constant 0 : i32
    %c0_i32_0 = arith.constant 0 : i32
    %c0_i32_1 = arith.constant 0 : i32
    return %c0_i32, %c0_i32_0 : i32, i32
  }
  func.func @transform_7(%arg0: i32) -> (i32, i32) {
    %c0_i32 = arith.constant 0 : i32
    %c0_i32_0 = arith.constant 0 : i32
    return %arg0, %c0_i32 : i32, i32
  }
}

</mosaic_0001>

<bundles_post_ra>
// kernel: tpu_custom_call.1
= control target key start
LH: loop header
LB: loop body
LE: loop exit
PB: predicated region body
PF: predicated region fallthrough
CT: control target
= control target key end

     0   :  { %12 = vsyncpa [#allocation3], 0  ;;  %s1171_s0 = inlined_call_operand.vmem [shape: f32[25,64], index: 0, kind: input, shape index: {}]   ;;  %s1172_s1 = inlined_call_operand.vmem [shape: f32[25,16], index: 1, kind: input, shape index: {}]   ;;  %s1173_s2 = inlined_call_operand.hbm [shape: bf16[64,128], index: 2, kind: input, shape index: {}]   ;;  %s1174_s3 = inlined_call_operand.vmem [shape: bf16[16,128], index: 3, kind: input, shape index: {}]   ;;  %s1175_s4 = inlined_call_operand.vmem [shape: f32[1,128], index: 4, kind: input, shape index: {}]   ;;  %s1176_s5 = inlined_call_operand.hbm [shape: bf16[128,128], index: 5, kind: input, shape index: {}]   ;;  %s1177_s6 = inlined_call_operand.vmem [shape: f32[1,128], index: 6, kind: input, shape index: {}]   ;;  %s1178_s7 = inlined_call_operand.hbm [shape: f32[25,128], index: 7, kind: output, shape index: {}]  }
   0x1   :  { %13 = vsyncpa [#allocation6], 0 }
   0x2   :  { %14 = vsyncpa [#allocation4], 0 }
   0x3   :  { %16 = vsyncpa [#allocation4 + $0x1], 0  ;;  %s1016_s24 = smov 0   ;;  %s1018_s25 = smov 0  }
   0x4   :  { %s1020_s26 = smov 0   ;;  %s1022_s27 = smov 0  }
   0x5 LB: > { %s1037_s28 = sadd.s32 4294967295, %s967_s27   ;;  %s684_s29 = sadd.s32 4294967294, %s967_s27   ;;  %s967_s27 = sphi %s1022_s27, %s1192_s27   ;;  %s963_s26 = sphi %s1020_s26, %s1191_s26   ;;  %s959_s25 = sphi %s1018_s25, %s1190_s25   ;;  %s955_s24 = sphi %s1016_s24, %s1189_s24  }
   0x6   : > { %s1041_s30 = sadd.s32 1, %s967_s27   ;;  %s186_s8 = sadd.s32 1, %s963_s26 }
   0x7   : > { %s183_s9 = ssub.s32 %s967_s27, %s1041_s30  ;;  %p196_p0 = scmp.ne.s32.totalorder %s963_s26, %s959_s25 }
   0x8   : > { %p184_p1 = scmp.eq.s32.totalorder %s183_s9, 0  ;;  %p197_p2 = scmp.eq.s32.totalorder %s1037_s28, 3 }
   0x9   : > { %p202_p3 = scmp.ne.s32.totalorder %s959_s25, %s955_s24  ;;  %p203_p4 = scmp.eq.s32.totalorder %s684_s29, 3 }
   0xa   : > { %s1052_s10 = scalar_select %p184_p1, %s963_s26, %s186_s8  }
   0xb   : > { %p1054_p5 = por %p197_p2, %p196_p0  ;;  %p1058_p6 = por %p203_p4, %p202_p3 }
   0xc   : > { %p685_p7 = scmp.ge.s32.totalorder %s967_s27, 1  ;;  %p210_p8 = scmp.lt.s32.totalorder %s967_s27, 5 }
   0xd   : > { %s1181_s12 = scalar_select %p1058_p6, 1, 0 }
   0xe   : > { %p1179_p9 = scmp.eq.s32.totalorder %s1037_s28, 0  ;;  %p1065_p10 = pnand %p685_p7, %p210_p8 }
   0xf   : > { %s969_s14 = smov [#allocation2]   ;;  %s970_s17 = smov [#allocation5]  }
  0x10   : > { %s222_s15 = sshll.u32 %s969_s14, 4  ;;  %p780_p11 = pneg %p1065_p10  ;;  %s223_s15 = int_to_ptr.vmem [resolvable:$true] %s222_s15 }
  0x11   : > { %s241_s18 = sshll.u32 %s970_s17, 4  ;;  %s858_s19 = scalar_lea.vmem %s223_s15, 512  ;;  %s242_s18 = int_to_ptr.vmem [resolvable:$true] %s241_s18 }
  0x12   : > { %p1073_p12 = pnand %p1179_p9, %p780_p11  ;;  %p859_p0 = scmp.ne.s32.totalorder %s223_s15, %s858_s19 }
  0x13   : > { %p866_p3 = scmp.lt.s32.totalorder %s223_s15, %s223_s15  ;;  %p867_p4 = scmp.lt.s32.totalorder %s858_s19, %s858_s19 }
  0x14   : > { %p849_p13 = pneg %p1073_p12 }
  0x15   : > { %p868_p7 = por %p867_p4, %p866_p3 }
  0x16   : > { %p861_p1 = pnand %p859_p0, %p849_p13 }
  0x18   : > { %p862_p2 = pneg %p861_p1 }
  0x1a   : > { %p869_p8 = pnand %p868_p7, %p862_p2 }
  0x1c   : > { %872 = shalt.err (!%p869_p8)
}
  0x1d   : > { %s971_s20 = smov 64   ;;  %s972_s21 = smov 4  }
  0x1e   : > { %783 = dma.hbm_to_vmem [thread:$0]  (!%p1073_p12), %s1173_s2, 512, %s223_s15, [#allocation3], %s971_s20, %s971_s20, %s972_s21  }
  0x1f   : > { %s884_s29 = scalar_lea.vmem %s242_s18, 1024  ;;  %p892_p9 = scmp.lt.s32.totalorder %s242_s18, %s242_s18 }
  0x20   : > { %p885_p11 = scmp.ne.s32.totalorder %s242_s18, %s884_s29  ;;  %p893_p6 = scmp.lt.s32.totalorder %s884_s29, %s884_s29 }
  0x22   : > { %p887_p0 = pnand %p885_p11, %p849_p13  ;;  %p894_p3 = por %p893_p6, %p892_p9 }
  0x24   : > { %p888_p1 = pneg %p887_p0 }
  0x26   : > { %p895_p2 = pnand %p894_p3, %p888_p1 }
  0x28   : > { %898 = shalt.err (!%p895_p2)
}
  0x29   : > { %786 = dma.hbm_to_vmem [thread:$0]  (!%p1073_p12), %s1176_s5, 1024, %s242_s18, [#allocation6], %s971_s20, %s971_s20, %s972_s21  }
  0x2a   : > { %274 = sbr.rel (%p1065_p10) target bundleno = 488 (0x1e8), region = 48  ;;  %p1184_p4 = scmp.eq.s32.totalorder (!%p1065_p10), %s1037_s28, 0 }
  0x2f   : > { %942 = dma.done.wait (%p1184_p4), [#allocation3], 512   ;;  %p1185_p13 = pmov %p1184_p4 }
  0x30   : > { %p1186_p7 = pmov %p1184_p4 }
  0x31   : > { %944 = vsyncadd (%p1185_p13), [#allocation3], 4294966784 }
  0x32   : > { %946 = dma.done.wait (%p1186_p7), [#allocation6], 1024   ;;  %p1187_p6 = pmov %p1184_p4 }
  0x33   : > { %p313_p9 = scmp.lt.s32.totalorder %s1037_s28, 3  ;;  %v973_v0 = vmov 0.0   ;;  %vm974_vm0 = vmmov 0   ;;  %v834_v1 = vld [vmem:[%s1174_s3] sm:$0xff]   ;;  %vm342_vm1 = vcmask 130048   ;;  %v835_v4 = vld [vmem:[#allocation2 + $0x18] sm:$0xff]  }
  0x34   : > { %948 = vsyncadd (%p1187_p6), [#allocation6], 4294966272  ;;  %732 = vmatprep.subr.bf16.mxu1 %v973_v0  ;;  %734 = vmatprep.mubr.msk.bf16.mxu1 %vm974_vm0, %v973_v0  ;;  %v836_v5 = vld [vmem:[#allocation2 + $0x10] sm:$0xff]   ;;  %v839_v6 = vld [vmem:[#allocation5 + $0x38] sm:$0xff]   ;;  %vm410_vm2 = vcmask 523264   ;;  %s310_s8 = sand.u32 1, %s959_s25  }
  0x35   : > { %s314_s13 = scalar_select %p313_p9, %s1037_s28, 3  ;;  %750 = vmatprep.subr.bf16.mxu0 %v973_v0  ;;  %766 = vmatprep.mubr.msk.bf16.mxu0 %vm974_vm0, %v973_v0  ;;  %v840_v7 = vld [vmem:[#allocation5 + $0x30] sm:$0xff]   ;;  %v837_v8 = vld [vmem:[#allocation2 + $0x8] sm:$0xff]   ;;  %v838_v10 = vld [vmem:[#allocation2] sm:$0xff]  }
  0x36   : > { %733 = vmatpush3.bf16.msra.mxu1 %v834_v1  ;;  %751 = vmatpush3.bf16.msra.mxu0 %v839_v6  ;;  %v841_v12 = vld [vmem:[#allocation5 + $0x28] sm:$0xff]   ;;  %v842_v13 = vld [vmem:[#allocation5 + $0x20] sm:$0xff]   ;;  %v843_v14 = vld [vmem:[#allocation5 + $0x18] sm:$0xff]   ;;  %s692_s9 = sshll.u32 %s310_s8, 3  ;;  %s713_s15 = sshll.u32 %s1037_s28, 7 }
  0x37   : > { %s693_s14 = sshll.u32 %s314_s13, 3  ;;  %738 = vmatprep.subr.bf16.mxu1 %v973_v0  ;;  %752 = vmatprep.subr.bf16.mxu0 %v973_v0  ;;  %v844_v15 = vld [vmem:[#allocation5 + $0x10] sm:$0xff]   ;;  %v845_v16 = vld [vmem:[#allocation5 + $0x8] sm:$0xff]   ;;  %v846_v17 = vld [vmem:[#allocation5] sm:$0xff]   ;;  %s312_s16 = scalar_lea.vmem [#allocation7], %s692_s9 }
  0x38   : > { %s320_s17 = scalar_lea.vmem %s1172_s1, %s693_s14  ;;  %s316_s22 = scalar_lea.vmem %s1171_s0, %s693_s14  ;;  %v702_v23 = vld [vmem:[%s1175_s4] ss:$0 sm:$0xff] }
  0x39   : > { %v324_v2 = vld [vmem:[%s320_s17] sm:$0xff]  ;;  %s591_s17 = sshll.u32 %s312_s16, 4  ;;  %s1130_s20 = scalar_lea.hbm %s1178_s7, %s713_s15  ;;  %s1132_s17 = int_to_ptr.vmem [resolvable:$true] %s591_s17 }
  0x3a   : > { %v325_v3 = vpack.c.bf16 %v324_v2, %v324_v2  ;;  %753 = vmatpush3.bf16.msra.mxu0 %v840_v7  ;;  %v322_v9 = vld [vmem:[%s316_s22] sm:$0xff]  ;;  %s578_s21 = scalar_lea.sflag [#allocation4], %s310_s8  ;;  %s899_s28 = scalar_lea.vmem %s1132_s17, 128 }
  0x3b   : > { %754 = vmatprep.subr.bf16.mxu0 %v973_v0  ;;  %v323_v11 = vpack.c.bf16 %v322_v9, %v322_v9  ;;  %v703_v31 = vld [vmem:[%s1177_s6] ss:$0 sm:$0xff]  ;;  %p900_p10 = scmp.ne.s32.totalorder %s1132_s17, %s899_s28  ;;  %s975_s22 = smov [#allocation7]  }
  0x3c   : > { %735 = vmatmul.mubr.msk.bf16.vlgmr.msra.gmra.mxu1 %vm342_vm1, %v325_v3  ;;  %s903_s23 = sshll.u32 %s975_s22, 4  ;;  %s904_s23 = int_to_ptr.vmem [resolvable:$false] %s903_s23 }
  0x3d   : > { %739 = vmatpush3.bf16.msra.mxu1 %v835_v4  ;;  %746 = vmatprep.mubr.msk.bf16.mxu1 %vm974_vm0, %v973_v0  ;;  %p901_p12 = pnand %p900_p10, %p1054_p5  ;;  %s905_s29 = scalar_lea.vmem %s904_s23, 256 }
  0x3e   : > { %740 = vmatprep.subr.bf16.mxu1 %v973_v0  ;;  %755 = vmatpush3.bf16.msra.mxu0 %v841_v12  ;;  %p906_p11 = scmp.lt.s32.totalorder %s1132_s17, %s904_s23  ;;  %p907_p0 = scmp.lt.s32.totalorder %s905_s29, %s899_s28 }
  0x3f   : > { %756 = vmatprep.subr.bf16.mxu0 %v973_v0  ;;  %p902_p8 = pneg %p901_p12 }
  0x40   : > { %p908_p1 = por %p907_p0, %p906_p11 }
  0x41   : > { %741 = vmatpush3.bf16.msra.mxu1 %v836_v5 }
  0x42   : > { %742 = vmatprep.subr.bf16.mxu1 %v973_v0  ;;  %757 = vmatpush3.bf16.msra.mxu0 %v842_v13  ;;  %p909_p3 = pnand %p908_p1, %p902_p8 }
  0x43   : > { %758 = vmatprep.subr.bf16.mxu0 %v973_v0 }
  0x45   : > { %743 = vmatpush3.bf16.msra.mxu1 %v837_v8 }
  0x46   : > { %744 = vmatprep.subr.bf16.mxu1 %v973_v0  ;;  %759 = vmatpush3.bf16.msra.mxu0 %v843_v14 }
  0x47   : > { %760 = vmatprep.subr.bf16.mxu0 %v973_v0 }
  0x49   : > { %745 = vmatpush3.bf16.msra.mxu1 %v838_v10 }
  0x4a   : > { %761 = vmatpush3.bf16.msra.mxu0 %v844_v15 }
  0x4b   : > { %762 = vmatprep.subr.bf16.mxu0 %v973_v0 }
  0x4c   : > { %747 = vmatmul.mubr.msk.bf16.vlgmr.msra.gmra.mxu1 %vm410_vm2, %v323_v11 }
  0x4e   : > { %763 = vmatpush3.bf16.msra.mxu0 %v845_v16 }
  0x4f   : > { %764 = vmatprep.subr.bf16.mxu0 %v973_v0 }
  0x52   : > { %765 = vmatpush3.bf16.msra.mxu0 %v846_v17 }
  0xfc   : > { %v380_v18 = vpop.f32.mrf.mxu1 }
  0xfe   : > { %v736_v19 = vpop.f32.mrf.mxu1 }
 0x100   : > { %v383_v20 = vpop.f32.mrf.mxu1 }
 0x102   : > { %v737_v21 = vpop.f32.mrf.mxu1 }
 0x10c   : > { %v448_v22 = vpop.f32.mrf.mxu1 }
 0x10d   : > { %v449_v24 = vadd.f32 %v448_v22, %v380_v18 }
 0x10e   : > { %v748_v25 = vpop.f32.mrf.mxu1 }
 0x10f   : > { %v461_v26 = vadd.f32 %v702_v23, %v449_v24 }
 0x110   : > { %v451_v27 = vpop.f32.mrf.mxu1 }
 0x111   : > { %v462_v28 = vmax.f32 %v461_v26, 0.0 }
 0x112   : > { %v749_v29 = vpop.f32.mrf.mxu1 }
 0x113   : > { %v463_v30 = vpack.c.bf16 %v462_v28, %v462_v28 }
 0x115   : > { %767 = vmatmul.mubr.bf16.vlgmr.msra.gmra.mxu0 %v463_v30 }
 0x1d5   : > { %v569_v32 = vpop.f32.mrf.mxu0 }
 0x1d6   : > { %v570_v33 = vadd.f32 %v703_v31, %v569_v32 }
 0x1d7   : > { %v768_v34 = vpop.f32.mrf.mxu0 }
 0x1d8   : > { %v575_v35 = vmax.f32 %v570_v33, 0.0 }
 0x1d9   : > { %v572_v36 = vpop.f32.mrf.mxu0 }
 0x1da   : > { %576 = vst [vmem:[%s312_s16] sm:$0xff] %v575_v35 }
 0x1db   : > { %v769_v37 = vpop.f32.mrf.mxu0 }
 0x1dc   : > { %912 = shalt.err (!%p909_p3)
}
 0x1dd   : > { %s913_s9 = scalar_lea.hbm %s1130_s20, 128  ;;  %s917_s14 = scalar_lea.hbm %s1178_s7, 512 }
 0x1de   : > { %p914_p2 = scmp.ne.s32.totalorder %s1130_s20, %s913_s9  ;;  %p918_p7 = scmp.lt.s32.totalorder %s1130_s20, %s1178_s7 }
 0x1df   : > { %p919_p6 = scmp.lt.s32.totalorder %s917_s14, %s913_s9 }
 0x1e0   : > { %p915_p4 = pnand %p914_p2, %p1054_p5 }
 0x1e1   : > { %p920_p9 = por %p919_p6, %p918_p7 }
 0x1e2   : > { %p916_p13 = pneg %p915_p4 }
 0x1e4   : > { %p921_p10 = pnand %p920_p9, %p916_p13 }
 0x1e6   : > { %924 = shalt.err (!%p921_p10)
}
 0x1e7   : > { %778 = dma.vmem_to_hbm [thread:$0]  (%p1054_p5), %s1132_s17, 128, %s1130_s20, %s578_s21  }
 0x1e8 PF: > { %p795_p12 = scmp.ge.s32.totalorder %s967_s27, 2  ;;  %s603_s18 = sand.u32 1, %s955_s24  }
 0x1e9   : > { %p1188_p8 = scmp.ne.s32.totalorder %s1181_s12, 0  ;;  %s604_s19 = scalar_lea.sflag [#allocation4], %s603_s18 }
 0x1eb   : > { %p788_p11 = pnand %p795_p12, %p1188_p8 }
 0x1ed   : > { %p789_p0 = pneg %p788_p11 }
 0x1ef   : > { %950 = dma.done.wait (%p789_p0), %s604_s19, 128  }
 0x1f0   : > { %952 = vsyncadd (%p789_p0), %s604_s19, 4294967168  ;;  %p19_p1 = scmp.ge.s32.totalorder %s1041_s30, 6   ;;  %s1189_s24 = smov %s959_s25 }
 0x1f1   : > { %s1190_s25 = smov %s963_s26  ;;  %s1191_s26 = smov %s1052_s10 }
 0x1f2   : > { %s1192_s27 = smov %s1041_s30  ;;  %21 = sbr.rel (!%p19_p1) target bundleno = 5 (0x5), region = 95 }
 0x1f7   :  { %609 = vsyncpa [#allocation3], 1 }
 0x1f8   :  { %611 = vsyncpa [#allocation3 + $0x1], 1 }
 0x1f9   :  { %612 = vsyncpa [#allocation6], 1 }
 0x1fa   :  { %613 = vsyncpa [#allocation4], 1 }
 0x1fb   :  { %615 = vsyncpa [#allocation4 + $0x1], 1 }

</bundles_post_ra>
